<compile_context>
chip_gen: v5e
topology: v5e:2x2
jax: 0.10.0
libtpu: 0.0.40
codegen_flags: <defaults>
</compile_context>

<pallas_src>
import functools

import numpy as np
import jax
import jax.numpy as jnp
from jax import lax
from jax.experimental import pallas as pl
from jax.experimental.pallas import tpu as pltpu

EPS = float(np.finfo(np.float64).eps)  # matches MAPELoss default eps (by spec)

LANES = 128                   # TPU lane width
SUBLANES = 8                  # f32 sublane count; partial sums are (8, width)
MAX_WIDTH = 2048              # widest slab last-dim we try (lane-dense stores)
MAX_BLOCK_ELEMS = 1 << 20     # 1Mi elements = 4 MiB per f32 tile
MIN_SPLIT_ELEMS = 1 << 17     # below this a single grid step is cheapest
STRIP_ELEMS = 1 << 16         # 64Ki elements (~256 KiB f32) folded per strip
VMEM_LIMIT_BYTES = 32 * 1024 * 1024  # raises v5e's 16 MiB default; < v7x phys


def _round_up(x, m):
    return ((x + m - 1) // m) * m


def _pick_layout(numel):
    """Choose (width, rows, pad) for the flattened (rows, width) slab.

    Prefer a zero-copy layout (pad == 0, width divides numel exactly, widest
    lane-dense width wins).  Only ragged / tiny tensors fall back to zero-
    padding the flat array up to a multiple of 8*128 (one small copy)."""
    if numel % LANES == 0 and numel >= SUBLANES * LANES:
        width = LANES
        w = MAX_WIDTH
        while w > LANES:
            if numel % w == 0 and numel // w >= SUBLANES:
                width = w
                break
            w //= 2
        pad = 0
    else:
        width = LANES
        pad = _round_up(max(numel, SUBLANES * LANES), SUBLANES * LANES) - numel
    rows = (numel + pad) // width
    return width, rows, pad


def _pick_block_rows(rows, width):
    """Tile rows: ~4 MiB f32 tiles, >=2 grid steps for v7x megacore."""
    max_block_rows = max(32, MAX_BLOCK_ELEMS // width)
    if rows * width <= MIN_SPLIT_ELEMS:
        return _round_up(rows, SUBLANES)          # tiny: single block
    if rows > 2 * max_block_rows:
        return max_block_rows                     # large: max-size tiles
    # medium: at least two grid steps so both v7x TensorCores get work
    return min(max_block_rows, _round_up(pl.cdiv(rows, 2), 32))


def _mape_ratio(x, t, eps):
    x = x.astype(jnp.float32)
    t = t.astype(jnp.float32)
    return jnp.abs(x - t) / jnp.maximum(jnp.abs(t), eps)


def _mape_elementwise_kernel(x_ref, t_ref, o_ref, *, eps):
    o_ref[...] = _mape_ratio(x_ref[...], t_ref[...], eps).astype(o_ref.dtype)


def _mape_partial_sum_kernel(x_ref, t_ref, o_ref, *, eps, width, block_rows,
                             strip_rows, valid_rows, mask_tail):
    """Fold a (block_rows, width) tile into an (8, width) partial-sum tile.

    Strips are loaded, converted and folded one at a time so the full f32
    ratio for a 4 MiB block is never materialised in VMEM (keeps the budget
    for the double-buffered input tiles)."""

    def fold(row_start, n_rows, acc):
        x = x_ref[pl.ds(row_start, n_rows), :]
        t = t_ref[pl.ds(row_start, n_rows), :]
        ratio = _mape_ratio(x, t, eps)
        if mask_tail:
            # Mask rows past the valid end of the slab (partial last block):
            # those rows are never DMA'd and hold unspecified data.
            gr = (pl.program_id(0) * block_rows + row_start
                  + lax.broadcasted_iota(jnp.int32, (n_rows, width), 0))
            ratio = jnp.where(gr < valid_rows, ratio, 0.0)
        # (n_rows, width) -> (n_rows//8, 8, width) -> (8, width): VPU adds only
        return acc + jnp.sum(ratio.reshape(-1, SUBLANES, width), axis=0)

    acc = jnp.zeros((SUBLANES, width), jnp.float32)
    n_strips = block_rows // strip_rows
    rem = block_rows % strip_rows                 # static, multiple of 8
    if n_strips > 0:
        def body(s, a):
            r0 = pl.multiple_of(s * strip_rows, strip_rows)
            return fold(r0, strip_rows, a)
        acc = lax.fori_loop(0, n_strips, body, acc)
    if rem > 0:
        acc = fold(n_strips * strip_rows, rem, acc)
    o_ref[...] = acc


def mape_loss(inp, target, reduction="mean", eps=EPS):
    assert reduction in ("none", "mean", "sum")
    assert inp.shape == target.shape
    assert inp.size > 0
    orig_shape = inp.shape
    numel = inp.size
    out_dtype = jnp.promote_types(inp.dtype, target.dtype)

    width, rows, pad = _pick_layout(numel)
    block_rows = _pick_block_rows(rows, width)
    grid = (pl.cdiv(rows, block_rows),)
    mask_tail = (rows % block_rows) != 0

    def slab(a):
        flat = a.reshape(-1)
        if pad:
            # Ragged tail only (numel not a multiple of 128): one small copy;
            # zero padding contributes exactly 0 to the sum.
            flat = jnp.pad(flat, (0, pad))
        return flat.reshape(rows, width)

    x2d, t2d = slab(inp), slab(target)

    in_specs = [
        pl.BlockSpec((block_rows, width), lambda i: (i, 0)),
        pl.BlockSpec((block_rows, width), lambda i: (i, 0)),
    ]
    params = pltpu.CompilerParams(
        dimension_semantics=("parallel",),      # both v7x TensorCores stream
        vmem_limit_bytes=VMEM_LIMIT_BYTES,      # 24 MiB worst-case live tiles
    )

    if reduction == "none":
        out2d = pl.pallas_call(
            functools.partial(_mape_elementwise_kernel, eps=eps),
            out_shape=jax.ShapeDtypeStruct((rows, width), out_dtype),
            grid_spec=pltpu.PrefetchScalarGridSpec(
                num_scalar_prefetch=0,
                grid=grid,
                in_specs=in_specs,
                out_specs=pl.BlockSpec((block_rows, width), lambda i: (i, 0)),
            ),
            compiler_params=params,
        )(x2d, t2d)
        flat = out2d.reshape(-1)
        if pad:
            flat = flat[:numel]                 # only ragged shapes hit this
        return flat.reshape(orig_shape)

    # mean / sum: lane-dense per-block (8, width) partial sums, parallel grid.
    strip_rows = max(SUBLANES, STRIP_ELEMS // width)
    partials = pl.pallas_call(
        functools.partial(
            _mape_partial_sum_kernel, eps=eps, width=width,
            block_rows=block_rows, strip_rows=strip_rows,
            valid_rows=rows, mask_tail=mask_tail),
        out_shape=jax.ShapeDtypeStruct((grid[0] * SUBLANES, width), jnp.float32),
        grid_spec=pltpu.PrefetchScalarGridSpec(
            num_scalar_prefetch=0,
            grid=grid,
            in_specs=in_specs,
            out_specs=pl.BlockSpec((SUBLANES, width), lambda i: (i, 0)),
        ),
        compiler_params=params,
    )(x2d, t2d)

    total = jnp.sum(partials)                   # tiny final reduction in JAX
    if reduction == "mean":
        total = total / numel
    return total.astype(out_dtype)


def mape_loss_ref(inp, target, reduction="mean", eps=EPS):
    out = jnp.abs(inp - target) / jnp.maximum(jnp.abs(target), eps)
    if reduction == "none":
        return out
    s = jnp.sum(out)
    if reduction == "mean":
        s = s / out.size
    return s


if __name__ == "__main__":
    key = jax.random.PRNGKey(0)
    k1, k2, k3, k4, k5, k6 = jax.random.split(key, 6)

    # Main example: image-style regression target (N, C, H, W).
    x = jax.random.normal(k1, (2, 4, 16, 16), dtype=jnp.float32)
    t = jax.random.normal(k2, (2, 4, 16, 16), dtype=jnp.float32)

    out_mean = jax.block_until_ready(mape_loss(x, t, reduction="mean"))
    out_sum = jax.block_until_ready(mape_loss(x, t, reduction="sum"))
    out_none = jax.block_until_ready(mape_loss(x, t, reduction="none"))

    np.testing.assert_allclose(np.asarray(out_mean),
                               np.asarray(mape_loss_ref(x, t, "mean")),
                               rtol=1e-5, atol=1e-5)
    np.testing.assert_allclose(np.asarray(out_sum),
                               np.asarray(mape_loss_ref(x, t, "sum")),
                               rtol=1e-5, atol=1e-2)
    np.testing.assert_allclose(np.asarray(out_none),
                               np.asarray(mape_loss_ref(x, t, "none")),
                               rtol=1e-5, atol=1e-6)

    # Ragged shape (numel % 128 != 0): exercises the zero-pad fallback path.
    xr = jax.random.normal(k3, (3, 5, 7), dtype=jnp.float32)
    tr = jax.random.normal(k4, (3, 5, 7), dtype=jnp.float32)
    np.testing.assert_allclose(
        np.asarray(jax.block_until_ready(mape_loss(xr, tr, "mean"))),
        np.asarray(mape_loss_ref(xr, tr, "mean")), rtol=1e-5, atol=1e-5)
    np.testing.assert_allclose(
        np.asarray(jax.block_until_ready(mape_loss(xr, tr, "none"))),
        np.asarray(mape_loss_ref(xr, tr, "none")), rtol=1e-5, atol=1e-6)

    # numel % 128 == 0 but rows not a multiple of the block: exercises the
    # in-kernel tail mask (sum) and clipped partial-block writes (none).
    xp = jax.random.normal(k5, (3, 3, 128), dtype=jnp.float32)
    tp = jax.random.normal(k6, (3, 3, 128), dtype=jnp.float32)
    np.testing.assert_allclose(
        np.asarray(jax.block_until_ready(mape_loss(xp, tp, "sum"))),
        np.asarray(mape_loss_ref(xp, tp, "sum")), rtol=1e-5, atol=1e-2)
    np.testing.assert_allclose(
        np.asarray(jax.block_until_ready(mape_loss(xp, tp, "none"))),
        np.asarray(mape_loss_ref(xp, tp, "none")), rtol=1e-5, atol=1e-6)

    # Medium tensor: exercises the wide (2048-lane) slab, the >=2-step
    # parallel grid and the fori_loop strip accumulation.
    xm = jax.random.normal(k5, (4, 64, 1024), dtype=jnp.float32)
    tm = jax.random.uniform(k6, (4, 64, 1024), dtype=jnp.float32,
                            minval=0.5, maxval=1.5)
    np.testing.assert_allclose(
        np.asarray(jax.block_until_ready(mape_loss(xm, tm, "mean"))),
        np.asarray(mape_loss_ref(xm, tm, "mean")), rtol=1e-4, atol=1e-5)
    np.testing.assert_allclose(
        np.asarray(jax.block_until_ready(mape_loss(xm, tm, "sum"))),
        np.asarray(mape_loss_ref(xm, tm, "sum")), rtol=1e-4, atol=1e-1)

    # Dtype handling for 'none': output keeps the (promoted) input dtype.
    out_bf16 = jax.block_until_ready(
        mape_loss(x.astype(jnp.bfloat16), t.astype(jnp.bfloat16), "none"))
    assert out_bf16.dtype == jnp.bfloat16 and out_bf16.shape == x.shape

    print("KERNEL_OK")
</pallas_src>

<mosaic_0001>
module attributes {stable_mosaic.version = 11 : i64} {
  func.func @_mape_partial_sum_kernel(%arg0: i32, %arg1: memref<8x256xf32, #tpu.memory_space<vmem>>, %arg2: memref<8x256xf32, #tpu.memory_space<vmem>>, %arg3: memref<8x256xf32, #tpu.memory_space<vmem>>) attributes {dimension_semantics = [#tpu.dimension_semantics<parallel>], iteration_bounds = array<i64: 1>, scalar_prefetch = 0 : i64, scratch_operands = 0 : i64, tpu.core_type = #tpu.core_type<tc>, window_params = [{transform_indices = @transform_0, window_bounds = array<i64: 8, 256>}, {transform_indices = @transform_1, window_bounds = array<i64: 8, 256>}, {transform_indices = @transform_2, window_bounds = array<i64: 8, 256>}]} {
    %cst = arith.constant 0.000000e+00 : f32
    %0 = vector.broadcast %cst : f32 to vector<8x256xf32>
    %c0 = arith.constant 0 : index
    %c0_0 = arith.constant 0 : index
    %1 = vector.load %arg1[%c0, %c0_0] : memref<8x256xf32, #tpu.memory_space<vmem>>, vector<8x256xf32>
    %c0_1 = arith.constant 0 : index
    %c0_2 = arith.constant 0 : index
    %2 = vector.load %arg2[%c0_1, %c0_2] : memref<8x256xf32, #tpu.memory_space<vmem>>, vector<8x256xf32>
    %3 = arith.subf %1, %2 : vector<8x256xf32>
    %4 = math.absf %3 : vector<8x256xf32>
    %5 = math.absf %2 : vector<8x256xf32>
    %cst_3 = arith.constant 2.22044605E-16 : f32
    %6 = vector.broadcast %cst_3 : f32 to vector<8x256xf32>
    %7 = arith.maximumf %5, %6 : vector<8x256xf32>
    %8 = arith.divf %4, %7 : vector<8x256xf32>
    %9 = vector.shape_cast %8 : vector<8x256xf32> to vector<1x8x256xf32>
    %cst_4 = arith.constant dense<0.000000e+00> : vector<8x256xf32>
    %10 = vector.multi_reduction <add>, %9, %cst_4 [0] : vector<1x8x256xf32> to vector<8x256xf32>
    %11 = arith.addf %0, %10 : vector<8x256xf32>
    %c0_5 = arith.constant 0 : index
    %c0_6 = arith.constant 0 : index
    %12 = vector.load %arg3[%c0_5, %c0_6] : memref<8x256xf32, #tpu.memory_space<vmem>>, vector<8x256xf32>
    tpu.vector_store %arg3[%c0_5, %c0_6], %11 {strides = array<i32>} : memref<8x256xf32, #tpu.memory_space<vmem>>, vector<8x256xf32>,
    return
  }
  func.func @transform_0(%arg0: i32) -> (i32, i32) {
    %c0_i32 = arith.constant 0 : i32
    %c0_i32_0 = arith.constant 0 : i32
    return %arg0, %c0_i32 : i32, i32
  }
  func.func @transform_1(%arg0: i32) -> (i32, i32) {
    %c0_i32 = arith.constant 0 : i32
    %c0_i32_0 = arith.constant 0 : i32
    return %arg0, %c0_i32 : i32, i32
  }
  func.func @transform_2(%arg0: i32) -> (i32, i32) {
    %c0_i32 = arith.constant 0 : i32
    %c0_i32_0 = arith.constant 0 : i32
    return %arg0, %c0_i32 : i32, i32
  }
}

</mosaic_0001>

<bundles_post_ra>
// kernel: tpu_custom_call.1
= control target key start
LH: loop header
LB: loop body
LE: loop exit
PB: predicated region body
PF: predicated region fallthrough
CT: control target
= control target key end

     0   :  { %7 = vsyncpa [#allocation3], 0  ;;  %s224_s0 = inlined_call_operand.hbm [shape: f32[8,256], index: 0, kind: input, shape index: {}]   ;;  %s225_s1 = inlined_call_operand.hbm [shape: f32[8,256], index: 1, kind: input, shape index: {}]   ;;  %s226_s2 = inlined_call_operand.hbm [shape: f32[8,256], index: 2, kind: output, shape index: {}]  }
   0x1   :  { %8 = vsyncpa [#allocation6], 0 }
   0x2   :  { %9 = vsyncpa [#allocation4], 0  ;;  %s15_s11 = sshll.u32 %s224_s0, 4  ;;  %s191_s12 = smov [#allocation2]   ;;  %s16_s11 = int_to_ptr.hbm [resolvable:$true] %s15_s11 }
   0x3   :  { %s17_s13 = sshll.u32 %s191_s12, 4  ;;  %s26_s16 = sshll.u32 %s225_s1, 4  ;;  %s18_s13 = int_to_ptr.vmem [resolvable:$true] %s17_s13  ;;  %s27_s16 = int_to_ptr.hbm [resolvable:$true] %s26_s16 }
   0x4   :  { %20 = dma.hbm_to_vmem [thread:$0]  %s16_s11, 256, %s18_s13, [#allocation3]  }
   0x5   :  { %s192_s17 = smov [#allocation5]  }
   0x6   :  { %s28_s18 = sshll.u32 %s192_s17, 4  ;;  %s29_s18 = int_to_ptr.vmem [resolvable:$true] %s28_s18 }
   0x7   :  { %31 = dma.hbm_to_vmem [thread:$0]  %s27_s16, 256, %s29_s18, [#allocation6]  }
   0x8   :  { %185 = dma.done.wait [#allocation3], 256  }
   0x9   :  { %186 = vsyncadd [#allocation3], 4294967040 }
   0xa   :  { %187 = dma.done.wait [#allocation6], 256  }
   0xb   :  { %188 = vsyncadd [#allocation6], 4294967040  ;;  %v42_v0 = vld [vmem:[#allocation5] sm:$0xff]  ;;  %v43_v2 = vld [vmem:[#allocation5 + $0x8] sm:$0xff]  ;;  %s193_s0 = smov [#allocation7]   ;;  %s95_s21 = sshll.u32 %s226_s2, 4  ;;  %s96_s21 = int_to_ptr.hbm [resolvable:$true] %s95_s21 }
   0xc   :  { %v48_v1 = vand.u32 2147483647, %v42_v0  ;;  %v49_v3 = vand.u32 2147483647, %v43_v2  ;;  %v40_v6 = vld [vmem:[#allocation2] sm:$0xff]  ;;  %v41_v7 = vld [vmem:[#allocation2 + $0x8] sm:$0xff] }
   0xd   :  { %v44_v10 = vsub.f32 %v40_v6, %v42_v0  ;;  %v45_v13 = vsub.f32 %v41_v7, %v43_v2  ;;  %s93_s1 = sshll.u32 %s193_s0, 4  ;;  %s94_s1 = int_to_ptr.vmem [resolvable:$true] %s93_s1 }
   0xe   :  { %v50_v4 = vmax.f32 %v48_v1, 2.220446e-16  ;;  %v51_v5 = vmax.f32 %v49_v3, 2.220446e-16 }
   0xf   :  { %v46_v24 = vand.u32 2147483647, %v44_v10  ;;  %v47_v27 = vand.u32 2147483647, %v45_v13 }
  0x10   :  { %109 = vrcp.f32 %v50_v4  ;;  %vm57_vm0 = vweird.f32 %v50_v4  ;;  %v63_v12 = vand.u32 2147483648, %v50_v4  ;;  %v61_v16 = vand.u32 2147483647, %v50_v4 }
  0x11   :  { %111 = vrcp.f32 %v51_v5  ;;  %v78_v17 = vand.u32 2147483648, %v51_v5  ;;  %vm72_vm2 = vweird.f32 %v51_v5  ;;  %v76_v19 = vand.u32 2147483647, %v51_v5 }
  0x12   :  { %v64_v22 = vor.u32 1.1754944e-38, %v63_v12  ;;  %vm62_vm5 = vcmp.eq.f32.partialorder %v61_v16, 8.507059e+37 }
  0x13   :  { %v79_v26 = vor.u32 1.1754944e-38, %v78_v17  ;;  %vm77_vm7 = vcmp.eq.f32.partialorder %v76_v19, 8.507059e+37 }
  0x16   :  { %v110_v8 = vpop.eup %109 }
  0x17   :  { %v112_v9 = vpop.eup %111  ;;  %v53_v11 = vmul.f32 %v110_v8, %v50_v4  ;;  %vm58_vm1 = vweird.f32 %v110_v8 }
  0x18   :  { %v68_v14 = vmul.f32 %v112_v9, %v51_v5  ;;  %vm73_vm3 = vweird.f32 %v112_v9  ;;  %vm215_vm4 = vmor %vm57_vm0, %vm58_vm1 }
  0x19   :  { %v54_v15 = vsub.f32 1.0, %v53_v11  ;;  %vm74_vm6 = vmor %vm72_vm2, %vm73_vm3 }
  0x1a   :  { %v69_v18 = vsub.f32 1.0, %v68_v14 }
  0x1b   :  { %v55_v20 = vmul.f32 %v110_v8, %v54_v15 }
  0x1c   :  { %v70_v23 = vmul.f32 %v112_v9, %v69_v18 }
  0x1d   :  { %v56_v25 = vadd.f32 %v110_v8, %v55_v20 }
  0x1e   :  { %v71_v28 = vadd.f32 %v112_v9, %v70_v23 }
  0x1f   :  { %v60_v29 = vsel %vm215_vm4, %v110_v8, %v56_v25 }
  0x20   :  { %v65_v30 = vsel %vm62_vm5, %v64_v22, %v60_v29  ;;  %v75_v31 = vsel %vm74_vm6, %v112_v9, %v71_v28 }
  0x21   :  { %v66_v32 = vmul.f32 %v65_v30, %v46_v24  ;;  %v80_v33 = vsel %vm77_vm7, %v79_v26, %v75_v31 }
  0x22   :  { %v81_v34 = vmul.f32 %v80_v33, %v47_v27 }
  0x23   :  { %86 = vst [vmem:[#allocation7] sm:$0xff] %v66_v32 }
  0x24   :  { %87 = vst [vmem:[#allocation7 + $0x8] sm:$0xff] %v81_v34 }
  0x25   :  { %98 = dma.vmem_to_hbm [thread:$0]  %s94_s1, 256, %s96_s21, [#allocation4]  }
  0x26   :  { %189 = dma.done.wait [#allocation4], 256  }
  0x27   :  { %190 = vsyncadd [#allocation4], 4294967040 }
  0x28   :  { %103 = vsyncpa [#allocation3], 1 }
  0x29   :  { %104 = vsyncpa [#allocation6], 1 }
  0x2a   :  { %105 = vsyncpa [#allocation4], 1 }

</bundles_post_ra>
